<compile_context>
chip_gen: v7x
topology: tpu7x:2x2x1
jax: 0.10.0
libtpu: 0.0.40
codegen_flags: <defaults>
</compile_context>

<pallas_src>
import functools

import jax
import jax.numpy as jnp
from jax.experimental import pallas as pl
from jax.experimental.pallas import tpu as pltpu

_LANES = 128


def _layernorm_kernel(x_ref, a_ref, b_ref, o_ref, *, eps):
    """Normalizes each row (axis 0) over all remaining axes.

    x_ref: (TB, F) or (TB, F//128, 128); a_ref/b_ref: (1, ...) float32 with the
    same trailing shape; o_ref: same shape as x_ref, original dtype.
    """
    x = x_ref[...].astype(jnp.float32)
    red_axes = tuple(range(1, x.ndim))
    n = 1
    for d in x.shape[1:]:
        n *= d
    mean = jnp.mean(x, axis=red_axes, keepdims=True)
    diff = x - mean
    # torch.std default: unbiased estimator (divide by N-1).
    var = jnp.sum(diff * diff, axis=red_axes, keepdims=True) * jnp.float32(1.0 / (n - 1))
    std = jnp.sqrt(var)
    # eps added to std (not var) to match the PyTorch module exactly.
    inv = pl.reciprocal(std + jnp.float32(eps), approx=True)  # EUP slot, not VALU
    y = a_ref[...] * (diff * inv) + b_ref[...]
    o_ref[...] = y.astype(o_ref.dtype)


def _vmem_capacity_bytes():
    try:
        return int(pltpu.get_tpu_info().vmem_capacity_bytes)
    except Exception:
        return 64 * 1024 * 1024  # conservative fallback: v7x per-TensorCore VMEM


def _choose_row_tile(B, F, itemsize, budget_bytes):
    """Rows per grid step so double-buffered in+out tiles + f32 temps fit budget."""
    per_row = F * (4 * itemsize + 4 * 4)  # 2x in + 2x out tiles, ~4 f32 temporaries
    tb = int(budget_bytes // max(per_row, 1))
    if tb >= B:
        return B
    sub = 8 * max(1, 4 // max(itemsize, 1))  # sublane multiple: 8 f32 / 16 bf16 / 32 int8
    tb = max(sub, (tb // sub) * sub)
    # TODO(synk): for F so large that even `sub` rows overflow VMEM, switch to a
    # two-pass F-tiled scheme (pass 1: sum/sumsq per row; pass 2: normalize).
    return min(tb, B)


def layer_norm(x, a_2, b_2, eps=1e-6, block_rows=None):
    """x: (B, C, S); a_2, b_2: (C*S,). Returns (B, C, S)."""
    B, C, S = x.shape
    F = C * S
    assert a_2.shape == (F,) and b_2.shape == (F,)
    assert F >= 2, "unbiased std needs at least 2 elements per row"

    itemsize = jnp.dtype(x.dtype).itemsize
    vmem_cap = _vmem_capacity_bytes()
    # Use ~1/3 of physical VMEM for the pipeline working set -> headroom for
    # Mosaic internal scratch on every generation (v5e/v6e 128 MiB, v7x 64 MiB).
    budget = vmem_cap // 3
    TB = block_rows if block_rows is not None else _choose_row_tile(B, F, itemsize, budget)
    grid = (pl.cdiv(B, TB),)

    # Hoist the param casts out of the kernel: pass f32, keep blocks resident.
    a_f32 = a_2.astype(jnp.float32)
    b_f32 = b_2.astype(jnp.float32)

    if F % _LANES == 0:
        # Lane/sublane-dense layout: each row becomes an (F//128, 128) slab so
        # every vreg is fully occupied and stores are unmasked, even when the
        # batch (or row tile) is smaller than 8.
        Fsub = F // _LANES
        x_in = x.reshape(B, Fsub, _LANES)
        a_in = a_f32.reshape(1, Fsub, _LANES)
        b_in = b_f32.reshape(1, Fsub, _LANES)
        blk, pblk = (TB, Fsub, _LANES), (1, Fsub, _LANES)
        x_map = lambda i: (i, 0, 0)
        p_map = lambda i: (0, 0, 0)
    else:
        x_in = x.reshape(B, F)
        a_in = a_f32.reshape(1, F)
        b_in = b_f32.reshape(1, F)
        blk, pblk = (TB, F), (1, F)
        x_map = lambda i: (i, 0)
        p_map = lambda i: (0, 0)

    # Explicit scoped-VMEM budget: double-buffered in+out tiles, resident
    # params, plus generous slack for f32 intermediates / compiler scratch.
    tile_bytes = TB * F * itemsize
    needed = 4 * tile_bytes + 2 * F * 4 + 6 * TB * F * 4
    vmem_limit = int(min(max(needed, 16 * 1024 * 1024), int(vmem_cap * 0.75)))

    kernel = functools.partial(_layernorm_kernel, eps=eps)

    out = pl.pallas_call(
        kernel,
        out_shape=jax.ShapeDtypeStruct(x_in.shape, x.dtype),
        grid=grid,
        in_specs=[
            pl.BlockSpec(blk, x_map),
            pl.BlockSpec(pblk, p_map),
            pl.BlockSpec(pblk, p_map),
        ],
        out_specs=pl.BlockSpec(blk, x_map),
        compiler_params=pltpu.CompilerParams(
            dimension_semantics=("parallel",),  # shard B-tiles across v7x's 2 TCs
            vmem_limit_bytes=vmem_limit,
        ),
    )(x_in, a_in, b_in)

    return out.reshape(B, C, S)


def _reference(x, a_2, b_2, eps):
    B, C, S = x.shape
    F = C * S
    x2 = x.reshape(B, F).astype(jnp.float32)
    mean = jnp.mean(x2, axis=-1, keepdims=True)
    std = jnp.sqrt(jnp.sum((x2 - mean) ** 2, axis=-1, keepdims=True) / (F - 1))
    y = a_2.astype(jnp.float32) * (x2 - mean) / (std + eps) + b_2.astype(jnp.float32)
    return y.reshape(B, C, S).astype(x.dtype)


if __name__ == "__main__":
    key = jax.random.PRNGKey(0)
    k1, k2 = jax.random.split(key)

    # Case 1: the module's nominal small shape (F = C*S = 32, 2D path, one block).
    B1, C1, S1 = 2, 4, 8
    x1 = jax.random.normal(k1, (B1, C1, S1), dtype=jnp.float32)
    a1 = jnp.ones((C1 * S1,), dtype=jnp.float32)
    b1 = jnp.zeros((C1 * S1,), dtype=jnp.float32)
    out1 = jax.block_until_ready(layer_norm(x1, a1, b1, eps=1e-6))

    # Case 2: lane/sublane-dense 3D path + multi-step pipelined grid with a
    # partial final block (B=20 rows, TB=8 -> grid of 3 steps).
    B2, C2, S2 = 20, 8, 128
    x2 = jax.random.normal(k2, (B2, C2, S2), dtype=jnp.float32)
    a2 = 0.5 + 0.01 * jnp.arange(C2 * S2, dtype=jnp.float32)
    b2 = 0.1 * jnp.ones((C2 * S2,), dtype=jnp.float32)
    out2 = jax.block_until_ready(layer_norm(x2, a2, b2, eps=1e-6, block_rows=8))

    # Tolerance accounts for the EUP approximate reciprocal (~1e-3 rel error);
    # outputs are O(1)-O(10) z-scores, so 2e-2 comfortably bounds it.
    ref1 = _reference(x1, a1, b1, 1e-6)
    ref2 = _reference(x2, a2, b2, 1e-6)
    assert jnp.allclose(out1, ref1, atol=2e-2, rtol=2e-2), "case 1 mismatch vs reference"
    assert jnp.allclose(out2, ref2, atol=2e-2, rtol=2e-2), "case 2 mismatch vs reference"

    print("KERNEL_OK")
</pallas_src>

<mosaic_0001>
module attributes {stable_mosaic.version = 11 : i64} {
  func.func @_layernorm_kernel(%arg0: i32, %arg1: memref<2x32xf32, #tpu.memory_space<vmem>>, %arg2: memref<1x32xf32, #tpu.memory_space<vmem>>, %arg3: memref<1x32xf32, #tpu.memory_space<vmem>>, %arg4: memref<2x32xf32, #tpu.memory_space<vmem>>) attributes {dimension_semantics = [#tpu.dimension_semantics<parallel>], iteration_bounds = array<i64: 1>, scalar_prefetch = 0 : i64, scratch_operands = 0 : i64, tpu.core_type = #tpu.core_type<tc>, window_params = [{transform_indices = @transform_0, window_bounds = array<i64: 2, 32>}, {pipeline_mode = #tpu.pipeline_mode<synchronous>, transform_indices = @transform_1, window_bounds = array<i64: 1, 32>}, {pipeline_mode = #tpu.pipeline_mode<synchronous>, transform_indices = @transform_2, window_bounds = array<i64: 1, 32>}, {transform_indices = @transform_3, window_bounds = array<i64: 2, 32>}]} {
    %c0 = arith.constant 0 : index
    %c0_0 = arith.constant 0 : index
    %0 = vector.load %arg1[%c0, %c0_0] : memref<2x32xf32, #tpu.memory_space<vmem>>, vector<2x32xf32>
    %cst = arith.constant dense<0.000000e+00> : vector<2xf32>
    %1 = vector.multi_reduction <add>, %0, %cst [1] : vector<2x32xf32> to vector<2xf32>
    %2 = vector.shape_cast %1 : vector<2xf32> to vector<2x1xf32>
    %cst_1 = arith.constant 3.200000e+01 : f32
    %3 = vector.broadcast %cst_1 : f32 to vector<2x1xf32>
    %4 = arith.divf %2, %3 : vector<2x1xf32>
    %5 = vector.broadcast %4 : vector<2x1xf32> to vector<2x32xf32>
    %6 = arith.subf %0, %5 : vector<2x32xf32>
    %7 = arith.mulf %6, %6 : vector<2x32xf32>
    %cst_2 = arith.constant dense<0.000000e+00> : vector<2xf32>
    %8 = vector.multi_reduction <add>, %7, %cst_2 [1] : vector<2x32xf32> to vector<2xf32>
    %9 = vector.shape_cast %8 : vector<2xf32> to vector<2x1xf32>
    %cst_3 = arith.constant 0.0322580636 : f32
    %10 = vector.broadcast %cst_3 : f32 to vector<2x1xf32>
    %11 = arith.mulf %9, %10 : vector<2x1xf32>
    %12 = math.sqrt %11 : vector<2x1xf32>
    %cst_4 = arith.constant 9.99999997E-7 : f32
    %13 = vector.broadcast %cst_4 : f32 to vector<2x1xf32>
    %14 = arith.addf %12, %13 : vector<2x1xf32>
    %15 = tpu.reciprocal %14 {approx = true} : vector<2x1xf32> -> vector<2x1xf32>
    %c0_5 = arith.constant 0 : index
    %c0_6 = arith.constant 0 : index
    %16 = vector.load %arg2[%c0_5, %c0_6] : memref<1x32xf32, #tpu.memory_space<vmem>>, vector<1x32xf32>
    %17 = vector.broadcast %15 : vector<2x1xf32> to vector<2x32xf32>
    %18 = arith.mulf %6, %17 : vector<2x32xf32>
    %19 = vector.broadcast %16 : vector<1x32xf32> to vector<2x32xf32>
    %20 = arith.mulf %19, %18 : vector<2x32xf32>
    %c0_7 = arith.constant 0 : index
    %c0_8 = arith.constant 0 : index
    %21 = vector.load %arg3[%c0_7, %c0_8] : memref<1x32xf32, #tpu.memory_space<vmem>>, vector<1x32xf32>
    %22 = vector.broadcast %21 : vector<1x32xf32> to vector<2x32xf32>
    %23 = arith.addf %20, %22 : vector<2x32xf32>
    %c0_9 = arith.constant 0 : index
    %c0_10 = arith.constant 0 : index
    %24 = vector.load %arg4[%c0_9, %c0_10] : memref<2x32xf32, #tpu.memory_space<vmem>>, vector<2x32xf32>
    tpu.vector_store %arg4[%c0_9, %c0_10], %23 {strides = array<i32>} : memref<2x32xf32, #tpu.memory_space<vmem>>, vector<2x32xf32>,
    return
  }
  func.func @transform_0(%arg0: i32) -> (i32, i32) {
    %c0_i32 = arith.constant 0 : i32
    %c0_i32_0 = arith.constant 0 : i32
    return %arg0, %c0_i32 : i32, i32
  }
  func.func @transform_1(%arg0: i32) -> (i32, i32) {
    %c0_i32 = arith.constant 0 : i32
    %c0_i32_0 = arith.constant 0 : i32
    %c0_i32_1 = arith.constant 0 : i32
    return %c0_i32, %c0_i32_0 : i32, i32
  }
  func.func @transform_2(%arg0: i32) -> (i32, i32) {
    %c0_i32 = arith.constant 0 : i32
    %c0_i32_0 = arith.constant 0 : i32
    %c0_i32_1 = arith.constant 0 : i32
    return %c0_i32, %c0_i32_0 : i32, i32
  }
  func.func @transform_3(%arg0: i32) -> (i32, i32) {
    %c0_i32 = arith.constant 0 : i32
    %c0_i32_0 = arith.constant 0 : i32
    return %arg0, %c0_i32 : i32, i32
  }
}

</mosaic_0001>

<bundles_post_ra>
// kernel: tpu_custom_call.1
= control target key start
LH: loop header
LB: loop body
LE: loop exit
PB: predicated region body
PF: predicated region fallthrough
CT: control target
= control target key end

     0   :  { %8 = vsyncpa [#allocation3], 0  ;;  %s193_s0 = inlined_call_operand.hbm [shape: f32[2,32], index: 0, kind: input, shape index: {}]   ;;  %s194_s1 = inlined_call_operand.vmem [shape: f32[1,32], index: 1, kind: input, shape index: {}]   ;;  %s195_s2 = inlined_call_operand.vmem [shape: f32[1,32], index: 2, kind: input, shape index: {}]   ;;  %s196_s3 = inlined_call_operand.hbm [shape: f32[2,32], index: 3, kind: output, shape index: {}]  }
   0x1   :  { %9 = vsyncpa [#allocation4], 0  ;;  %s138_s12 = smov [#allocation2]   ;;  %s90_s16 = scalar_lea.hbm %s193_s0, 32 }
   0x2   :  { %s16_s13 = sshll.u32 %s138_s12, 4  ;;  %p91_p0 = scmp.ne.s32.totalorder %s193_s0, %s90_s16  ;;  %s17_s13 = int_to_ptr.vmem [resolvable:$true] %s16_s13 }
   0x3   :  { %p94_p1 = scmp.lt.u32.totalorder %s90_s16, %s193_s0 }
   0x5   :  { %p96_p2 = pnand %p94_p1, %p91_p0 }
   0x7   :  { %99 = shalt.err (!%p96_p2)
}
   0x8   :  { %s100_s21 = scalar_lea.vmem %s17_s13, 32  ;;  %p105_p4 = scmp.lt.s32.totalorder %s17_s13, %s17_s13 }
   0x9   :  { %p101_p3 = scmp.ne.s32.totalorder %s17_s13, %s100_s21  ;;  %p106_p5 = scmp.lt.s32.totalorder %s100_s21, %s100_s21 }
   0xb   :  { %p107_p6 = por %p106_p5, %p105_p4 }
   0xd   :  { %p108_p7 = pnand %p107_p6, %p101_p3 }
   0xf   :  { %111 = shalt.err (!%p108_p7)
}
  0x10   :  { %19 = dma.hbm_to_vmem [thread:$0]  %s193_s0, 32, %s17_s13, [#allocation3]  }
  0x11   :  { %134 = dma.done.wait [#allocation3], 32  }
  0x12   :  { %135 = vsyncadd [#allocation3], 4294967264  ;;  %vm28_vm0 = vcmask 254976   ;;  %v27_v0 = vld [vmem:[#allocation2] sm:$0x3]  ;;  %s139_s27 = smov [#allocation5]  }
  0x13   :  { %v29_v1 = vsel %vm28_vm0, %v27_v0, 0.0  ;;  %v82_v16 = vld [vmem:[%s194_s1] ss:$0 sm:$0xff]  ;;  %s73_s28 = sshll.u32 %s139_s27, 4  ;;  %s74_s28 = int_to_ptr.vmem [resolvable:$true] %s73_s28 }
  0x14   :  { %30 = vadd.xlane.f32.xlu0 %v29_v1  ;;  %v83_v18 = vld [vmem:[%s195_s2] ss:$0 sm:$0xff]  ;;  %s112_s29 = scalar_lea.vmem %s74_s28, 32  ;;  %p117_p9 = scmp.lt.s32.totalorder %s74_s28, %s74_s28 }
  0x15   :  { %p113_p8 = scmp.ne.s32.totalorder %s74_s28, %s112_s29  ;;  %p118_p10 = scmp.lt.s32.totalorder %s112_s29, %s112_s29 }
  0x17   :  { %p119_p11 = por %p118_p10, %p117_p9 }
  0x19   :  { %p120_p12 = pnand %p119_p11, %p113_p8 }
  0xa1   :  { %v31_v2 = vpop.xlane.xlu0 %30 }
  0xa2   :  { %v33_v3 = vmul.f32 0.03125, %v31_v2 }
  0xa4   :  { %v34_v4 = vsub.f32 %v27_v0, %v33_v3 }
  0xa6   :  { %v35_v5 = vmul.f32 %v34_v4, %v34_v4 }
  0xa8   :  { %v36_v6 = vsel %vm28_vm0, %v35_v5, 0.0 }
  0xa9   :  { %37 = vadd.xlane.f32.xlu0 %v36_v6 }
 0x136   :  { %v38_v7 = vpop.xlane.xlu0 %37 }
 0x137   :  { %v39_v8 = vmul.f32 0.032258064, %v38_v7 }
 0x139   :  { %86 = vrsqrt.f32 %v39_v8  ;;  %vm42_vm1 = vcmp.eq.f32.partialorder %v39_v8, inf  ;;  %v45_v11 = vand.u32 2147483648, %v39_v8  ;;  %vm44_vm2 = vcmp.eq.f32.partialorder %v39_v8, 0.0 }
 0x143   :  { %v87_v9 = vpop.eup %86 }
 0x144   :  { %v41_v10 = vmul.f32 %v87_v9, %v39_v8 }
 0x146   :  { %v43_v12 = vsel %vm42_vm1, %v39_v8, %v41_v10 }
 0x147   :  { %v46_v13 = vsel %vm44_vm2, %v45_v11, %v43_v12 }
 0x148   :  { %v47_v14 = vadd.f32 1e-06, %v46_v13 }
 0x14a   :  { %88 = vrcp.f32 %v47_v14 }
 0x154   :  { %v89_v15 = vpop.eup %88 }
 0x155   :  { %v50_v17 = vmul.f32 %v89_v15, %v34_v4 }
 0x157   :  { %v57_v19 = vmul.f32 %v82_v16, %v50_v17 }
 0x159   :  { %v65_v20 = vadd.f32 %v83_v18, %v57_v19 }
 0x15b   :  { %66 = vst.msk [vmem:[#allocation5] sm:$0x3] %vm28_vm0, %v65_v20 }
 0x15c   :  { %123 = shalt.err (!%p120_p12)
}
 0x15d   :  { %s124_s4 = scalar_lea.hbm %s196_s3, 32 }
 0x15e   :  { %p125_p13 = scmp.ne.s32.totalorder %s196_s3, %s124_s4  ;;  %p128_p0 = scmp.lt.u32.totalorder %s124_s4, %s196_s3 }
 0x160   :  { %p130_p1 = pnand %p128_p0, %p125_p13 }
 0x162   :  { %133 = shalt.err (!%p130_p1)
}
 0x163   :  { %76 = dma.vmem_to_hbm [thread:$0]  %s74_s28, 32, %s196_s3, [#allocation4]  }
 0x164   :  { %136 = dma.done.wait [#allocation4], 32  }
 0x165   :  { %137 = vsyncadd [#allocation4], 4294967264 }
 0x166   :  { %80 = vsyncpa [#allocation3], 1 }
 0x167   :  { %81 = vsyncpa [#allocation4], 1 }

</bundles_post_ra>
